<compile_context>
chip_gen: v7x
topology: tpu7x:2x2x1
jax: 0.10.0
libtpu: 0.0.40
codegen_flags: <defaults>
</compile_context>

<pallas_src>
import functools

import jax
import jax.numpy as jnp
from jax import lax
from jax.experimental import pallas as pl
from jax.experimental.pallas import tpu as pltpu


def _mosaic_params(semantics, block_bytes, scratch_bytes=0):
    """dimension_semantics + explicit VMEM limit: double-buffered blocks + in-kernel
    temporaries + headroom, capped at v7x's 64 MiB physical VMEM."""
    limit = 2 * int(block_bytes) + int(scratch_bytes) + (16 << 20)
    return pltpu.CompilerParams(dimension_semantics=semantics,
                                vmem_limit_bytes=min(limit, 64 << 20))


# --------------------------------------------------------------------------
# EEM (edge enhance module): in-kernel 3x3 taps, fused imhead/ehead matmul,
# block-diagonal multi-head channel attention, 1x1 projection + residual.
# --------------------------------------------------------------------------

def _eem_body(xe, wall, wp, a1r, *, C2, num_heads, H, W):
    """xe: (3, HW) = [x_re, x_im, edge].  Returns the EEM image output (2, HW)."""
    HW = H * W
    ch = C2 // num_heads

    lane = lax.broadcasted_iota(jnp.int32, (1, HW), 1)
    row = lane // W
    col = lane - row * W

    # 3x3 zero-padded taps of (x0, x1, e), built with lane rotations (XLU) + boundary
    # masks; tap order di-major / dj-minor / channel-minor (matches `wall` columns).
    taps = []
    for di in range(3):
        for dj in range(3):
            off = (di - 1) * W + (dj - 1)
            if off == 0:
                taps.append(xe)
                continue
            shifted = pltpu.roll(xe, (-off) % HW, axis=1)   # shifted[p] = xe[(p+off) % HW]
            valid = ((row + (di - 1) >= 0) & (row + (di - 1) < H) &
                     (col + (dj - 1) >= 0) & (col + (dj - 1) < W))
            taps.append(jnp.where(valid, shifted, 0.0))
    tap_slab = jnp.concatenate(taps, axis=0)                              # (27, HW)

    # Fused imhead (conv1x1 o depthwise 3x3) + ehead (3x3) in one MXU matmul.
    qvk = jnp.dot(wall, tap_slab, preferred_element_type=jnp.float32)     # (3*C2, HW)
    q = qvk[:C2]            # imhead chunk 0
    v = qvk[C2:2 * C2]      # imhead chunk 1
    k = qvk[2 * C2:]        # ehead

    # F.normalize(dim=-1), eps = 1e-12 (kept in f32).
    qn = q * lax.rsqrt(jnp.maximum(jnp.sum(q * q, axis=-1, keepdims=True), 1e-24))
    kn = k * lax.rsqrt(jnp.maximum(jnp.sum(k * k, axis=-1, keepdims=True), 1e-24))

    # Block-diagonal multi-head attention: one (C2, C2) logit matrix, cross-head
    # entries masked to -inf BEFORE softmax, a1 applied per head row.
    att = lax.dot_general(qn, kn, (((1,), (1,)), ((), ())),
                          preferred_element_type=jnp.float32)             # (C2, C2)
    att = att * a1r                                                       # per-row head scale
    rhead = lax.broadcasted_iota(jnp.int32, (C2, C2), 0) // ch
    chead = lax.broadcasted_iota(jnp.int32, (C2, C2), 1) // ch
    att = jnp.where(rhead == chead, att, -jnp.inf)
    att = jnp.exp(att - jnp.max(att, axis=-1, keepdims=True))
    att = att / jnp.sum(att, axis=-1, keepdims=True)

    out = jnp.dot(att, v, preferred_element_type=jnp.float32)             # (C2, HW)
    # project_out (1x1, C2 -> 2) + residual.
    return xe[0:2] + jnp.dot(wp, out, preferred_element_type=jnp.float32)


def _make_eem_kernel(C2, num_heads, H, W):
    def kernel(xe_ref, wall_ref, wp_ref, a1r_ref, o_ref):
        o_ref[0] = _eem_body(xe_ref[0], wall_ref[...], wp_ref[...], a1r_ref[...],
                             C2=C2, num_heads=num_heads, H=H, W=W)
    return kernel


def _make_eem_expand_kernel(C2, num_heads, H, W):
    def kernel(xe_ref, sens_ref, wall_ref, wp_ref, a1r_ref, o_ref):
        xout = _eem_body(xe_ref[0], wall_ref[...], wp_ref[...], a1r_ref[...],
                         C2=C2, num_heads=num_heads, H=H, W=W)
        # expand_operator fused into the epilogue: complex_mul(xout, sens) per coil.
        xr, xi = xout[0:1], xout[1:2]                 # (1, HW)
        sr, si = sens_ref[0, 0], sens_ref[0, 1]       # (coils, HW)
        o_ref[0, 0] = xr * sr - xi * si
        o_ref[0, 1] = xr * si + xi * sr
    return kernel


def _eem_prep(x, e, params):
    B, Cx, H, W = x.shape
    assert Cx == 2
    HW = H * W
    C2 = params["we"].shape[0]
    num_heads = params["a1"].shape[0]
    ch = C2 // num_heads

    # Single (B, 3, HW) input slab [x_re, x_im, edge] — 3 rows instead of 31 (no im2col).
    xe = jnp.concatenate([x.astype(jnp.float32), e.astype(jnp.float32)],
                         axis=1).reshape(B, 3, HW)

    # Fuse conv1 (1x1, 2 -> 2*C2) with the depthwise 3x3: wf[c, t, cin] = w2[c, t]*w1[c, cin]
    wf = params["w2"][:, :, None] * params["w1"][:, None, :]              # (2*C2, 9, 2)
    # Block-diagonal weight over the stacked (x0, x1, e) taps; column index = 3*t + channel.
    zx = jnp.zeros((2 * C2, 9, 1), jnp.float32)
    ze = jnp.zeros((C2, 9, 2), jnp.float32)
    wall = jnp.concatenate(
        [jnp.concatenate([wf, zx], axis=2).reshape(2 * C2, 27),
         jnp.concatenate([ze, params["we"][:, :, None]], axis=2).reshape(C2, 27)],
        axis=0)                                                           # (3*C2, 27)
    a1r = jnp.repeat(params["a1"], ch, axis=0)                            # (C2, 1)
    return xe, wall, a1r, (B, H, W, HW, C2, num_heads)


def eem_forward(x, e, params, *, num_heads):
    """EEM only: (B, 2, H, W), (B, 1, H, W) -> (B, 2, H*W) float32."""
    xe, wall, a1r, (B, H, W, HW, C2, nh) = _eem_prep(x, e, params)
    assert nh == num_heads
    wp = params["wp"]
    blk = 4 * (3 * HW + 2 * HW) + 4 * (wall.size + wp.size + a1r.size)
    scratch = 4 * HW * (27 + 5 * C2 + 8)
    return pl.pallas_call(
        _make_eem_kernel(C2, num_heads, H, W),
        grid=(B,),
        in_specs=[
            pl.BlockSpec((1, 3, HW), lambda b: (b, 0, 0)),
            pl.BlockSpec((3 * C2, 27), lambda b: (0, 0)),
            pl.BlockSpec((2, C2), lambda b: (0, 0)),
            pl.BlockSpec((C2, 1), lambda b: (0, 0)),
        ],
        out_specs=pl.BlockSpec((1, 2, HW), lambda b: (b, 0, 0)),
        out_shape=jax.ShapeDtypeStruct((B, 2, HW), jnp.float32),
        compiler_params=_mosaic_params(("parallel",), blk, scratch),
    )(xe, wall, wp, a1r)


def eem_expand_forward(x, e, sens_kc, params, *, num_heads):
    """EEM with expand_operator fused into the epilogue -> (B, 2, coils, H*W)."""
    xe, wall, a1r, (B, H, W, HW, C2, nh) = _eem_prep(x, e, params)
    assert nh == num_heads
    wp = params["wp"]
    coils = sens_kc.shape[2]
    blk = 4 * (3 * HW + 2 * 2 * coils * HW) + 4 * (wall.size + wp.size + a1r.size)
    scratch = 4 * HW * (27 + 5 * C2 + 8)
    return pl.pallas_call(
        _make_eem_expand_kernel(C2, num_heads, H, W),
        grid=(B,),
        in_specs=[
            pl.BlockSpec((1, 3, HW), lambda b: (b, 0, 0)),
            pl.BlockSpec((1, 2, coils, HW), lambda b: (b, 0, 0, 0)),
            pl.BlockSpec((3 * C2, 27), lambda b: (0, 0)),
            pl.BlockSpec((2, C2), lambda b: (0, 0)),
            pl.BlockSpec((C2, 1), lambda b: (0, 0)),
        ],
        out_specs=pl.BlockSpec((1, 2, coils, HW), lambda b: (b, 0, 0, 0)),
        out_shape=jax.ShapeDtypeStruct((B, 2, coils, HW), jnp.float32),
        compiler_params=_mosaic_params(("parallel",), blk, scratch),
    )(xe, sens_kc, wall, wp, a1r)


# --------------------------------------------------------------------------
# DC_multicoil pieces that stay in Pallas: reduce_operator (coil-combining).
# --------------------------------------------------------------------------

def _reduce_kernel(x_ref, s_ref, o_ref):
    # sum over coils of complex_mul(x, conj(sens)); coil (sublane) axis reduced in-kernel.
    xr, xi = x_ref[0, 0], x_ref[0, 1]      # (coils, hw_tile)
    sr, si = s_ref[0, 0], s_ref[0, 1]
    o_ref[0, 0:1, :] = jnp.sum(xr * sr + xi * si, axis=0, keepdims=True)
    o_ref[0, 1:2, :] = jnp.sum(xi * sr - xr * si, axis=0, keepdims=True)


def _pick_hw_tile(HW, coils, target_bytes=2 << 20):
    """Largest multiple-of-128 divisor of HW whose (2, coils, tile) f32 block stays
    ~<= target_bytes (keeps blocks well inside VMEM at realistic sizes)."""
    if HW % 128 != 0:
        return HW
    per_lane = 2 * 2 * coils * 4
    cap = max(128, target_bytes // per_lane)
    best, t = 128, 128
    while t <= HW and t <= cap:
        if HW % t == 0:
            best = t
        t += 128
    return best


def reduce_operator_pallas(x_kc, sens_kc):
    """(B, 2, coils, HW) x (B, 2, coils, HW) -> (B, 2, HW)."""
    B, _, coils, HW = x_kc.shape
    hw_t = _pick_hw_tile(HW, coils)
    in_spec = pl.BlockSpec((1, 2, coils, hw_t), lambda b, t: (b, 0, 0, t))
    blk = 4 * (2 * 2 * coils * hw_t + 2 * hw_t)
    return pl.pallas_call(
        _reduce_kernel,
        grid=(B, HW // hw_t),
        in_specs=[in_spec, in_spec],
        out_specs=pl.BlockSpec((1, 2, hw_t), lambda b, t: (b, 0, t)),
        out_shape=jax.ShapeDtypeStruct((B, 2, HW), jnp.float32),
        compiler_params=_mosaic_params(("parallel", "parallel"), blk),
    )(x_kc, sens_kc)


# TODO(synk): 2-D FFT/IFFT (T.fft2 / T.ifft2, normalized=True, shift=False) have no
# clean Pallas TPU equivalent; they are computed with jnp.fft outside the kernels.
def _ifft2_to_kc(xf_c):
    """complex (B, coils, H, W) -> ifft2 (ortho) -> (B, 2, coils, H*W) float32."""
    B, coils, H, W = xf_c.shape
    rec = jnp.fft.ifft2(xf_c, axes=(-2, -1), norm="ortho")
    out = jnp.stack([jnp.real(rec), jnp.imag(rec)], axis=1).astype(jnp.float32)
    return out.reshape(B, 2, coils, H * W)


# --------------------------------------------------------------------------
# EAM forward = EEM + DC_multicoil
# --------------------------------------------------------------------------

def eam_forward(x, e, y, m, sens_map, params, *, num_heads, exact_dc=False):
    """The reference DC layer hardcodes iScale = mask_1 = 1, so `m` (and lamda) are
    unused and the DC update xin_f + (y - xin_f) == y.  exact_dc=False exploits that
    and skips expand -> fft2 -> combine; exact_dc=True keeps the chain bit-faithfully
    (with expand fused into the EEM kernel and the combine left to XLA fusion)."""
    del m
    B, _, H, W = x.shape
    coils = sens_map.shape[1]
    HW = H * W

    sens_kc = jnp.transpose(sens_map.astype(jnp.float32),
                            (0, 4, 1, 2, 3)).reshape(B, 2, coils, HW)
    y_c = (y[..., 0] + 1j * y[..., 1]).astype(jnp.complex64)           # (B, coils, H, W)

    if exact_dc:
        xin = eem_expand_forward(x, e, sens_kc, params, num_heads=num_heads)
        xin_c = (xin[:, 0] + 1j * xin[:, 1]).reshape(B, coils, H, W)
        xin_f = jnp.fft.fft2(xin_c, axes=(-2, -1), norm="ortho")
        xout_f = xin_f + (y_c - xin_f)     # DC combine in plain jnp (fuses with the FFTs)
        xrec = _ifft2_to_kc(xout_f)
    else:
        xrec = _ifft2_to_kc(y_c)           # degenerate DC: combine == y

    xred = reduce_operator_pallas(xrec, sens_kc)                        # reduce_operator
    return xred.reshape(B, 2, H, W)


def init_params(C2, num_heads, key):
    k1, k2, k3, k4 = jax.random.split(key, 4)
    return {
        "w1": 0.1 * jax.random.normal(k1, (2 * C2, 2), jnp.float32),   # Conv2d(2, 2*C2, 1), bias=False
        "w2": 0.1 * jax.random.normal(k2, (2 * C2, 9), jnp.float32),   # depthwise Conv2d(2*C2, 2*C2, 3); taps di*3+dj
        "we": 0.1 * jax.random.normal(k3, (C2, 9), jnp.float32),       # Conv2d(1, C2, 3), bias=False
        "wp": 0.1 * jax.random.normal(k4, (2, C2), jnp.float32),       # Conv2d(C2, 2, 1), bias=False
        "a1": jnp.ones((num_heads, 1), jnp.float32),                   # nn.Parameter(torch.ones(heads, 1, 1))
    }


def _eem_reference(x, e, params, num_heads):
    """Pure-jnp EEM reference (explicit zero-padded taps, per-head attention loop)."""
    B, _, H, W = x.shape
    C2 = params["we"].shape[0]
    ch = C2 // num_heads
    hp = "highest"

    x1 = jnp.einsum("oc,bchw->bohw", params["w1"], x, precision=hp)     # conv1 (1x1)
    x1p = jnp.pad(x1, ((0, 0), (0, 0), (1, 1), (1, 1)))
    ep = jnp.pad(e, ((0, 0), (0, 0), (1, 1), (1, 1)))
    q1 = jnp.zeros((B, 2 * C2, H, W), jnp.float32)
    keg = jnp.zeros((B, C2, H, W), jnp.float32)
    for di in range(3):
        for dj in range(3):
            t = di * 3 + dj
            q1 = q1 + params["w2"][None, :, t, None, None] * x1p[:, :, di:di + H, dj:dj + W]
            keg = keg + params["we"][None, :, t, None, None] * ep[:, 0:1, di:di + H, dj:dj + W]

    q_im, v_im = q1[:, :C2], q1[:, C2:]

    def heads(z):
        return z.reshape(B, num_heads, ch, H * W)

    q, k, v = heads(q_im), heads(keg), heads(v_im)
    q = q / jnp.maximum(jnp.sqrt(jnp.sum(q * q, -1, keepdims=True)), 1e-12)
    k = k / jnp.maximum(jnp.sqrt(jnp.sum(k * k, -1, keepdims=True)), 1e-12)
    attn = jnp.einsum("bhcd,bhkd->bhck", q, k, precision=hp) * params["a1"][None, :, :, None]
    attn = jax.nn.softmax(attn, axis=-1)
    out = jnp.einsum("bhck,bhkd->bhcd", attn, v, precision=hp).reshape(B, C2, H, W)
    out = x + jnp.einsum("oc,bchw->bohw", params["wp"], out, precision=hp)
    return out.reshape(B, 2, H * W)


if __name__ == "__main__":
    B, H, W = 2, 16, 16
    C, C1, C2, num_heads, coils = 2, 1, 4, 2, 4

    key = jax.random.PRNGKey(0)
    kp, kx, ke, ky, ks = jax.random.split(key, 5)
    params = init_params(C2, num_heads, kp)

    x = jax.random.normal(kx, (B, 2, H, W), jnp.float32)               # image (real/imag channels)
    e = jax.random.normal(ke, (B, 1, H, W), jnp.float32)               # edge map
    y = jax.random.normal(ky, (B, coils, H, W, 2), jnp.float32)        # measured k-space
    m = jnp.ones((B, 1, H, W, 1), jnp.float32)                         # mask (unused by reference DC)
    sens = jax.random.normal(ks, (B, coils, H, W, 2), jnp.float32)     # coil sensitivity maps

    fast = jax.jit(functools.partial(eam_forward, num_heads=num_heads, exact_dc=False))
    exact = jax.jit(functools.partial(eam_forward, num_heads=num_heads, exact_dc=True))
    eem = jax.jit(functools.partial(eem_forward, num_heads=num_heads))

    out = jax.block_until_ready(fast(x, e, y, m, sens, params))
    out_exact = jax.block_until_ready(exact(x, e, y, m, sens, params))
    eem_out = jax.block_until_ready(eem(x, e, params))

    assert out.shape == (B, 2, H, W) and out.dtype == jnp.float32
    # EEM Pallas kernel (in-kernel taps + block-diagonal attention) vs pure-jnp reference.
    eem_ref = _eem_reference(x, e, params, num_heads)
    assert jnp.allclose(eem_out, eem_ref, atol=1e-3, rtol=1e-3), "EEM kernel mismatch"
    # Degenerate-DC exploit: fast path must match the bit-faithful DC chain.
    assert jnp.allclose(out, out_exact, atol=1e-3, rtol=1e-3), "DC fast/exact mismatch"
    print("KERNEL_OK")
</pallas_src>

<mosaic_0001>
module attributes {stable_mosaic.version = 11 : i64} {
  func.func @_reduce_kernel(%arg0: i32, %arg1: i32, %arg2: memref<1x2x4x256xf32, #tpu.memory_space<vmem>>, %arg3: memref<1x2x4x256xf32, #tpu.memory_space<vmem>>, %arg4: memref<1x2x256xf32, #tpu.memory_space<vmem>>) attributes {dimension_semantics = [#tpu.dimension_semantics<parallel>, #tpu.dimension_semantics<parallel>], iteration_bounds = array<i64: 2, 1>, scalar_prefetch = 0 : i64, scratch_operands = 0 : i64, tpu.core_type = #tpu.core_type<tc>, window_params = [{transform_indices = @transform_0, window_bounds = array<i64: 1, 2, 4, 256>}, {transform_indices = @transform_1, window_bounds = array<i64: 1, 2, 4, 256>}, {transform_indices = @transform_2, window_bounds = array<i64: 1, 2, 256>}]} {
    %c0 = arith.constant 0 : index
    %c0_0 = arith.constant 0 : index
    %c0_1 = arith.constant 0 : index
    %c0_2 = arith.constant 0 : index
    %0 = vector.load %arg2[%c0, %c0_0, %c0_1, %c0_2] : memref<1x2x4x256xf32, #tpu.memory_space<vmem>>, vector<1x1x4x256xf32>
    %1 = vector.shape_cast %0 : vector<1x1x4x256xf32> to vector<4x256xf32>
    %c0_3 = arith.constant 0 : index
    %c1 = arith.constant 1 : index
    %c0_4 = arith.constant 0 : index
    %c0_5 = arith.constant 0 : index
    %2 = vector.load %arg2[%c0_3, %c1, %c0_4, %c0_5] : memref<1x2x4x256xf32, #tpu.memory_space<vmem>>, vector<1x1x4x256xf32>
    %3 = vector.shape_cast %2 : vector<1x1x4x256xf32> to vector<4x256xf32>
    %c0_6 = arith.constant 0 : index
    %c0_7 = arith.constant 0 : index
    %c0_8 = arith.constant 0 : index
    %c0_9 = arith.constant 0 : index
    %4 = vector.load %arg3[%c0_6, %c0_7, %c0_8, %c0_9] : memref<1x2x4x256xf32, #tpu.memory_space<vmem>>, vector<1x1x4x256xf32>
    %5 = vector.shape_cast %4 : vector<1x1x4x256xf32> to vector<4x256xf32>
    %c0_10 = arith.constant 0 : index
    %c1_11 = arith.constant 1 : index
    %c0_12 = arith.constant 0 : index
    %c0_13 = arith.constant 0 : index
    %6 = vector.load %arg3[%c0_10, %c1_11, %c0_12, %c0_13] : memref<1x2x4x256xf32, #tpu.memory_space<vmem>>, vector<1x1x4x256xf32>
    %7 = vector.shape_cast %6 : vector<1x1x4x256xf32> to vector<4x256xf32>
    %8 = arith.mulf %1, %5 : vector<4x256xf32>
    %9 = arith.mulf %3, %7 : vector<4x256xf32>
    %10 = arith.addf %8, %9 : vector<4x256xf32>
    %cst = arith.constant dense<0.000000e+00> : vector<256xf32>
    %11 = vector.multi_reduction <add>, %10, %cst [0] : vector<4x256xf32> to vector<256xf32>
    %12 = vector.shape_cast %11 : vector<256xf32> to vector<1x256xf32>
    %c0_14 = arith.constant 0 : index
    %c0_15 = arith.constant 0 : index
    %c0_16 = arith.constant 0 : index
    %13 = vector.load %arg4[%c0_14, %c0_15, %c0_16] : memref<1x2x256xf32, #tpu.memory_space<vmem>>, vector<1x1x256xf32>
    %14 = vector.shape_cast %13 : vector<1x1x256xf32> to vector<1x256xf32>
    %15 = vector.shape_cast %12 : vector<1x256xf32> to vector<1x1x256xf32>
    tpu.vector_store %arg4[%c0_14, %c0_15, %c0_16], %15 {strides = array<i32>} : memref<1x2x256xf32, #tpu.memory_space<vmem>>, vector<1x1x256xf32>,
    %16 = arith.mulf %3, %5 : vector<4x256xf32>
    %17 = arith.mulf %1, %7 : vector<4x256xf32>
    %18 = arith.subf %16, %17 : vector<4x256xf32>
    %cst_17 = arith.constant dense<0.000000e+00> : vector<256xf32>
    %19 = vector.multi_reduction <add>, %18, %cst_17 [0] : vector<4x256xf32> to vector<256xf32>
    %20 = vector.shape_cast %19 : vector<256xf32> to vector<1x256xf32>
    %c0_18 = arith.constant 0 : index
    %c1_19 = arith.constant 1 : index
    %c0_20 = arith.constant 0 : index
    %21 = vector.load %arg4[%c0_18, %c1_19, %c0_20] : memref<1x2x256xf32, #tpu.memory_space<vmem>>, vector<1x1x256xf32>
    %22 = vector.shape_cast %21 : vector<1x1x256xf32> to vector<1x256xf32>
    %23 = vector.shape_cast %20 : vector<1x256xf32> to vector<1x1x256xf32>
    tpu.vector_store %arg4[%c0_18, %c1_19, %c0_20], %23 {strides = array<i32>} : memref<1x2x256xf32, #tpu.memory_space<vmem>>, vector<1x1x256xf32>,
    return
  }
  func.func @transform_0(%arg0: i32, %arg1: i32) -> (i32, i32, i32, i32) {
    %c0_i32 = arith.constant 0 : i32
    %c0_i32_0 = arith.constant 0 : i32
    %c0_i32_1 = arith.constant 0 : i32
    return %arg0, %c0_i32, %c0_i32_0, %arg1 : i32, i32, i32, i32
  }
  func.func @transform_1(%arg0: i32, %arg1: i32) -> (i32, i32, i32, i32) {
    %c0_i32 = arith.constant 0 : i32
    %c0_i32_0 = arith.constant 0 : i32
    %c0_i32_1 = arith.constant 0 : i32
    return %arg0, %c0_i32, %c0_i32_0, %arg1 : i32, i32, i32, i32
  }
  func.func @transform_2(%arg0: i32, %arg1: i32) -> (i32, i32, i32) {
    %c0_i32 = arith.constant 0 : i32
    %c0_i32_0 = arith.constant 0 : i32
    return %arg0, %c0_i32, %arg1 : i32, i32, i32
  }
}

</mosaic_0001>

<bundles_post_ra>
// kernel: eam_forward.1
= control target key start
LH: loop header
LB: loop body
LE: loop exit
PB: predicated region body
PF: predicated region fallthrough
CT: control target
= control target key end

     0   :  { %s498_s9 = smov 0   ;;  %s500_s10 = smov 0   ;;  %s538_s0 = inlined_call_operand.vmem [shape: f32[2,2,4,256], index: 0, kind: input, shape index: {}]   ;;  %s539_s1 = inlined_call_operand.vmem [shape: f32[2,2,4,256], index: 1, kind: input, shape index: {}]   ;;  %s540_s2 = inlined_call_operand.vmem [shape: f32[2,2,256], index: 2, kind: output, shape index: {}]  }
   0x1   :  { %s502_s11 = smov 0  }
   0x2 LB: > { %s24_s12 = sadd.s32 1, %s476_s10  ;;  %p418_p0 = scmp.ge.s32.totalorder %s480_s11, 1  ;;  %s480_s11 = sphi %s502_s11, %s12_s11   ;;  %s476_s10 = sphi %s500_s10, %s542_s10   ;;  %s472_s9 = sphi %s498_s9, %s541_s9  }
   0x3   : > { %p26_p1 = scmp.ge.s32.totalorder %s24_s12, 2  ;;  %p150_p2 = scmp.lt.s32.totalorder %s480_s11, 3 }
   0x5   : > { %s544_s12 = smov (%p26_p1, %s24_s12), 0  ;;  %p151_p3 = pnand %p418_p0, %p150_p2 }
   0x6   : > { %p190_p4 = scmp.lt.s32.totalorder (!%p151_p3), %s472_s9, 1  ;;  %vm231_vm0 = vcmask (!%p151_p3), 1043456   ;;  %v482_v22 = vmov (!%p151_p3), 1966171168   ;;  %v252_v24 = vlaneseq (!%p151_p3) }
   0x7   : > { %154 = sbr.rel (%p151_p3) target bundleno = 45 (0x2d), region = 28  ;;  %v250_v23 = vunpack.c.l.s4 (!%p151_p3), %v482_v22 }
   0x8   : > { %v253_v34 = vshrl.u32 (!%p151_p3), %v252_v24, 7  ;;  %vm266_vm1 = vcmp.lt.s32.totalorder (!%p151_p3), %v252_v24, 256 }
   0x9   : > { %v251_v33 = vunpack.c.0.s8 (!%p151_p3), %v250_v23 }
   0xb   : > { %v254_v44 = vsub.s32 (!%p151_p3), %v251_v33, %v253_v34 }
   0xe   : > { %s546_s9 = smov (!%p190_p4, %s472_s9), 1 }
   0xf   : > { %s430_s13 = sshll.u32 %s546_s9, 4  ;;  %s432_s20 = sshll.u32 %s546_s9, 2 }
  0x10   : > { %s197_s16 = scalar_lea.vmem %s538_s0, %s430_s13  ;;  %s207_s19 = scalar_lea.vmem %s539_s1, %s430_s13 }
  0x11   : > { %v219_v0 = vld [vmem:[%s197_s16] sm:$0xff]  ;;  %v425_v1 = vld [vmem:[%s197_s16 + $0x8] sm:$0xff]  ;;  %s217_s23 = scalar_lea.vmem %s540_s2, %s432_s20 }
  0x12   : > { %v222_v2 = vld [vmem:[%s207_s19] sm:$0xff]  ;;  %v426_v3 = vld [vmem:[%s207_s19 + $0x8] sm:$0xff] }
  0x13   : > { %v225_v4 = vmul.f32 %v222_v2, %v219_v0  ;;  %v269_v5 = vmul.f32 %v425_v1, %v222_v2  ;;  %v226_v6 = vmul.f32 %v426_v3, %v425_v1  ;;  %v270_v7 = vmul.f32 %v426_v3, %v219_v0 }
  0x15   : > { %v227_v8 = vadd.f32 %v226_v6, %v225_v4  ;;  %v271_v9 = vsub.f32 %v269_v5, %v270_v7 }
  0x17   : > { %v229_v10 = vcombine.high %v227_v8, %v227_v8  ;;  %v232_v11 = vsel %vm231_vm0, %v227_v8, 0.0  ;;  %v273_v12 = vcombine.high %v271_v9, %v271_v9  ;;  %v275_v13 = vsel %vm231_vm0, %v271_v9, 0.0 }
  0x18   : > { %v233_v14 = vrot.slane %v232_v11, 4  ;;  %v276_v15 = vrot.slane %v275_v13, 4 }
  0x19   : > { %v239_v16 = vsel %vm231_vm0, %v229_v10, 0.0  ;;  %v282_v17 = vsel %vm231_vm0, %v273_v12, 0.0 }
  0x1a   : > { %v234_v18 = vadd.f32 %v233_v14, %v232_v11  ;;  %v240_v19 = vrot.slane %v239_v16, 4  ;;  %v277_v20 = vadd.f32 %v276_v15, %v275_v13  ;;  %v283_v21 = vrot.slane %v282_v17, 4 }
  0x1c   : > { %v235_v25 = vrot.slane %v234_v18, 2  ;;  %v241_v26 = vadd.f32 %v240_v19, %v239_v16  ;;  %v278_v27 = vrot.slane %v277_v20, 2  ;;  %v284_v28 = vadd.f32 %v283_v21, %v282_v17 }
  0x1e   : > { %v236_v29 = vadd.f32 %v235_v25, %v234_v18  ;;  %v242_v30 = vrot.slane %v241_v26, 2  ;;  %v279_v31 = vadd.f32 %v278_v27, %v277_v20  ;;  %v285_v32 = vrot.slane %v284_v28, 2 }
  0x20   : > { %v237_v35 = vrot.slane %v236_v29, 1  ;;  %v243_v36 = vadd.f32 %v242_v30, %v241_v26  ;;  %v280_v37 = vrot.slane %v279_v31, 1  ;;  %v286_v38 = vadd.f32 %v285_v32, %v284_v28 }
  0x22   : > { %v238_v39 = vadd.f32 %v237_v35, %v236_v29  ;;  %v244_v40 = vrot.slane %v243_v36, 1  ;;  %v281_v41 = vadd.f32 %v280_v37, %v279_v31  ;;  %v287_v42 = vrot.slane %v286_v38, 1 }
  0x24   : > { %v245_v43 = vadd.f32 %v244_v40, %v243_v36  ;;  %v288_v45 = vadd.f32 %v287_v42, %v286_v38 }
  0x26   : > { %v248_v46 = vcombine.low %v238_v39, %v245_v43  ;;  %v291_v47 = vcombine.low %v281_v41, %v288_v45 }
  0x28   : > { %v255_v48 = vrot.slane %v248_v46, %v254_v44  ;;  %v298_v49 = vrot.slane %v291_v47, %v254_v44 }
  0x2a   : > { %v262_v50 = vrot.slane %v255_v48, %v254_v44  ;;  %v305_v51 = vrot.slane %v298_v49, %v254_v44 }
  0x2c   : > { %268 = vst.msk [vmem:[%s217_s23] ss:$2 sm:$0x3] %vm266_vm1, %v262_v50  ;;  %427 = vst.msk [vmem:[%s217_s23 + $0x1] ss:$2 sm:$0x3] %vm266_vm1, %v305_v51 }
  0x2d PF: > { %s12_s11 = sadd.s32 1, %s480_s11   ;;  %s541_s9 = smov %s476_s10 }
  0x2e   : > { %p9_p5 = scmp.ge.s32.totalorder %s12_s11, 4   ;;  %s542_s10 = smov %s544_s12 }
  0x30   :  { %11 = sbr.rel (!%p9_p5) target bundleno = 2 (0x2), region = 64 }

</bundles_post_ra>
